<compile_context>
chip_gen: v7x
topology: tpu7x:2x2x1
jax: 0.10.0
libtpu: 0.0.40
codegen_flags: <defaults>
</compile_context>

<pallas_src>
import jax
import jax.numpy as jnp
from jax.experimental import pallas as pl
from jax.experimental.pallas import tpu as pltpu


# -----------------------------------------------------------------------------
# Pallas kernel: per-batch fused  SiLU(W1^T x + temb) -> W2^T (.) + b2
# all operands channels-first, pixels (HW) on the lane axis.
# -----------------------------------------------------------------------------
def _diffusion_block_kernel(x_ref, temb_ref, w1t_ref, w2t_ref, b2_ref, o_ref):
    # x_ref:    (1, C, HW)   one batch element; channels on sublanes, pixels on lanes
    # temb_ref: (1, HID, 1)  time embedding of that batch element (b1 folded in)
    # w1t_ref:  (HID, C)     shared weights
    # w2t_ref:  (C, HID)
    # b2_ref:   (C, 1)
    # o_ref:    (1, C, HW)   lane-dense output (HW = multiple of 128)
    x = x_ref[0]                                                         # (C, HW)
    h = jnp.dot(w1t_ref[...], x, preferred_element_type=jnp.float32)    # (HID, HW)
    h = h + temb_ref[0]                         # (HID, 1) lane-broadcast over pixels
    h = h * jax.nn.sigmoid(h)                   # SiLU, f32 (v5e-safe)
    out = jnp.dot(w2t_ref[...], h, preferred_element_type=jnp.float32)  # (C, HW)
    o_ref[0] = (out + b2_ref[...]).astype(o_ref.dtype)


def diffusion_forward_pallas(x_nchw, t, params):
    """Forward pass. x_nchw: [B, C, H, W] float32, t: [B] int32."""
    B, C, H, W = x_nchw.shape
    HID = params["w1"].shape[1]
    HW = H * W

    # ---- glue: sinusoidal timestep embedding + tiny time MLP (not hot path) ----
    half = params["time_dim"] // 2
    freqs = jnp.exp(
        -jnp.log(10000.0) * jnp.arange(half, dtype=jnp.float32) / half)  # [half]
    args = t.astype(jnp.float32)[:, None] * freqs[None, :]               # [B, half]
    sin_emb = jnp.concatenate([jnp.sin(args), jnp.cos(args)], axis=-1)   # [B, time_dim]
    temb = sin_emb @ params["tw1"] + params["tb1"]
    temb = temb * jax.nn.sigmoid(temb)                                   # SiLU
    temb = temb @ params["tw2"] + params["tb2"]                          # [B, HID]
    temb = temb + params["b1"][None, :]                                  # fold conv1 bias
    temb = temb.reshape(B, HID, 1)                                       # bcast over HW

    # ---- glue: free contiguous reshape (no transpose) ----
    x_flat = x_nchw.reshape(B, C, HW)                                    # [B, C, HW]

    w1t = params["w1"].T                                                 # (HID, C)
    w2t = params["w2"].T                                                 # (C, HID)
    b2 = params["b2"].reshape(C, 1)

    out_flat = pl.pallas_call(
        _diffusion_block_kernel,
        out_shape=jax.ShapeDtypeStruct((B, C, HW), jnp.float32),
        grid_spec=pl.GridSpec(
            grid=(B,),
            in_specs=[
                pl.BlockSpec((1, C, HW), lambda b: (b, 0, 0)),    # x of batch b
                pl.BlockSpec((1, HID, 1), lambda b: (b, 0, 0)),   # temb of batch b
                pl.BlockSpec((HID, C), lambda b: (0, 0)),         # W1^T (resident)
                pl.BlockSpec((C, HID), lambda b: (0, 0)),         # W2^T (resident)
                pl.BlockSpec((C, 1), lambda b: (0, 0)),           # b2   (resident)
            ],
            out_specs=pl.BlockSpec((1, C, HW), lambda b: (b, 0, 0)),
        ),
        compiler_params=pltpu.CompilerParams(
            dimension_semantics=("parallel",)),
    )(x_flat, temb, w1t, w2t, b2)

    # ---- glue: free reshape back to NCHW ----
    return out_flat.reshape(B, C, H, W)


# -----------------------------------------------------------------------------
# Reference (plain JAX, 1x1-conv form) for correctness check
# -----------------------------------------------------------------------------
def diffusion_forward_ref(x_nchw, t, params):
    half = params["time_dim"] // 2
    freqs = jnp.exp(
        -jnp.log(10000.0) * jnp.arange(half, dtype=jnp.float32) / half)
    args = t.astype(jnp.float32)[:, None] * freqs[None, :]
    sin_emb = jnp.concatenate([jnp.sin(args), jnp.cos(args)], axis=-1)
    temb = sin_emb @ params["tw1"] + params["tb1"]
    temb = temb * jax.nn.sigmoid(temb)
    temb = temb @ params["tw2"] + params["tb2"]                          # [B, HID]

    h = jnp.einsum("bchw,cd->bdhw", x_nchw, params["w1"])
    h = h + params["b1"][None, :, None, None] + temb[:, :, None, None]
    h = h * jax.nn.sigmoid(h)
    out = jnp.einsum("bdhw,dc->bchw", h, params["w2"])
    out = out + params["b2"][None, :, None, None]
    return out


def init_params(key, C, HID, TIME_DIM):
    ks = jax.random.split(key, 6)
    scale = 0.1
    return {
        "time_dim": TIME_DIM,
        "tw1": scale * jax.random.normal(ks[0], (TIME_DIM, HID), jnp.float32),
        "tb1": jnp.zeros((HID,), jnp.float32),
        "tw2": scale * jax.random.normal(ks[1], (HID, HID), jnp.float32),
        "tb2": jnp.zeros((HID,), jnp.float32),
        "w1": scale * jax.random.normal(ks[2], (C, HID), jnp.float32),
        "b1": jnp.zeros((HID,), jnp.float32),
        "w2": scale * jax.random.normal(ks[3], (HID, C), jnp.float32),
        "b2": jnp.zeros((C,), jnp.float32),
    }


if __name__ == "__main__":
    B, C, H, W = 2, 4, 16, 16
    HID, TIME_DIM = 32, 32

    key = jax.random.PRNGKey(0)
    kx, kt, kp = jax.random.split(key, 3)
    x = jax.random.normal(kx, (B, C, H, W), jnp.float32)     # noisy data, NCHW
    t = jax.random.randint(kt, (B,), 0, 1000, jnp.int32)     # diffusion timesteps
    params = init_params(kp, C, HID, TIME_DIM)

    out = diffusion_forward_pallas(x, t, params)
    out = jax.block_until_ready(out)

    ref = diffusion_forward_ref(x, t, params)
    assert out.shape == (B, C, H, W)
    assert jnp.allclose(out, ref, atol=1e-4, rtol=1e-4)

    # TODO(synk): `sample`, `training_step` (noise loop / MSE loss) are host-side
    # orchestration around forward(); not part of the kernel hot path.
    print("KERNEL_OK")
</pallas_src>

<mosaic_0001>
module attributes {stable_mosaic.version = 11 : i64} {
  func.func @_diffusion_block_kernel(%arg0: i32, %arg1: memref<1x4x256xf32, #tpu.memory_space<vmem>>, %arg2: memref<1x32x1xf32, #tpu.memory_space<vmem>>, %arg3: memref<32x4xf32, #tpu.memory_space<vmem>>, %arg4: memref<4x32xf32, #tpu.memory_space<vmem>>, %arg5: memref<4x1xf32, #tpu.memory_space<vmem>>, %arg6: memref<1x4x256xf32, #tpu.memory_space<vmem>>) attributes {dimension_semantics = [#tpu.dimension_semantics<parallel>], iteration_bounds = array<i64: 2>, scalar_prefetch = 0 : i64, scratch_operands = 0 : i64, tpu.core_type = #tpu.core_type<tc>, window_params = [{transform_indices = @transform_0, window_bounds = array<i64: 1, 4, 256>}, {transform_indices = @transform_1, window_bounds = array<i64: 1, 32, 1>}, {pipeline_mode = #tpu.pipeline_mode<synchronous>, transform_indices = @transform_2, window_bounds = array<i64: 32, 4>}, {pipeline_mode = #tpu.pipeline_mode<synchronous>, transform_indices = @transform_3, window_bounds = array<i64: 4, 32>}, {pipeline_mode = #tpu.pipeline_mode<synchronous>, transform_indices = @transform_4, window_bounds = array<i64: 4, 1>}, {transform_indices = @transform_5, window_bounds = array<i64: 1, 4, 256>}]} {
    %c0 = arith.constant 0 : index
    %c0_0 = arith.constant 0 : index
    %c0_1 = arith.constant 0 : index
    %0 = vector.load %arg1[%c0, %c0_0, %c0_1] : memref<1x4x256xf32, #tpu.memory_space<vmem>>, vector<1x4x256xf32>
    %1 = vector.shape_cast %0 : vector<1x4x256xf32> to vector<4x256xf32>
    %c0_2 = arith.constant 0 : index
    %c0_3 = arith.constant 0 : index
    %2 = vector.load %arg3[%c0_2, %c0_3] : memref<32x4xf32, #tpu.memory_space<vmem>>, vector<32x4xf32>
    %cst = arith.constant dense<0.000000e+00> : vector<32x256xf32>
    %3 = tpu.matmul %2, %1, %cst {dimension_numbers = #tpu.dot_dimension_numbers<[1], [0], [0], [1], [0, 0, 1, 1], [], []>} : vector<32x4xf32>, vector<4x256xf32>, vector<32x256xf32> -> vector<32x256xf32>
    %c0_4 = arith.constant 0 : index
    %c0_5 = arith.constant 0 : index
    %c0_6 = arith.constant 0 : index
    %4 = vector.load %arg2[%c0_4, %c0_5, %c0_6] : memref<1x32x1xf32, #tpu.memory_space<vmem>>, vector<1x32x1xf32>
    %5 = vector.shape_cast %4 : vector<1x32x1xf32> to vector<32x1xf32>
    %6 = vector.broadcast %5 : vector<32x1xf32> to vector<32x256xf32>
    %7 = arith.addf %3, %6 : vector<32x256xf32>
    %8 = arith.negf %7 : vector<32x256xf32>
    %9 = math.exp %8 : vector<32x256xf32>
    %cst_7 = arith.constant 1.000000e+00 : f32
    %10 = vector.broadcast %cst_7 : f32 to vector<32x256xf32>
    %11 = arith.addf %10, %9 : vector<32x256xf32>
    %12 = arith.divf %10, %11 : vector<32x256xf32>
    %13 = arith.mulf %7, %12 : vector<32x256xf32>
    %c0_8 = arith.constant 0 : index
    %c0_9 = arith.constant 0 : index
    %14 = vector.load %arg4[%c0_8, %c0_9] : memref<4x32xf32, #tpu.memory_space<vmem>>, vector<4x32xf32>
    %cst_10 = arith.constant dense<0.000000e+00> : vector<4x256xf32>
    %15 = tpu.matmul %14, %13, %cst_10 {dimension_numbers = #tpu.dot_dimension_numbers<[1], [0], [0], [1], [0, 0, 1, 1], [], []>} : vector<4x32xf32>, vector<32x256xf32>, vector<4x256xf32> -> vector<4x256xf32>
    %c0_11 = arith.constant 0 : index
    %c0_12 = arith.constant 0 : index
    %16 = vector.load %arg5[%c0_11, %c0_12] : memref<4x1xf32, #tpu.memory_space<vmem>>, vector<4x1xf32>
    %17 = vector.broadcast %16 : vector<4x1xf32> to vector<4x256xf32>
    %18 = arith.addf %15, %17 : vector<4x256xf32>
    %c0_13 = arith.constant 0 : index
    %c0_14 = arith.constant 0 : index
    %c0_15 = arith.constant 0 : index
    %19 = vector.load %arg6[%c0_13, %c0_14, %c0_15] : memref<1x4x256xf32, #tpu.memory_space<vmem>>, vector<1x4x256xf32>
    %20 = vector.shape_cast %19 : vector<1x4x256xf32> to vector<4x256xf32>
    %21 = vector.shape_cast %18 : vector<4x256xf32> to vector<1x4x256xf32>
    tpu.vector_store %arg6[%c0_13, %c0_14, %c0_15], %21 {strides = array<i32>} : memref<1x4x256xf32, #tpu.memory_space<vmem>>, vector<1x4x256xf32>,
    return
  }
  func.func @transform_0(%arg0: i32) -> (i32, i32, i32) {
    %c0_i32 = arith.constant 0 : i32
    %c0_i32_0 = arith.constant 0 : i32
    %c0_i32_1 = arith.constant 0 : i32
    return %arg0, %c0_i32, %c0_i32_0 : i32, i32, i32
  }
  func.func @transform_1(%arg0: i32) -> (i32, i32, i32) {
    %c0_i32 = arith.constant 0 : i32
    %c0_i32_0 = arith.constant 0 : i32
    %c0_i32_1 = arith.constant 0 : i32
    return %arg0, %c0_i32, %c0_i32_0 : i32, i32, i32
  }
  func.func @transform_2(%arg0: i32) -> (i32, i32) {
    %c0_i32 = arith.constant 0 : i32
    %c0_i32_0 = arith.constant 0 : i32
    %c0_i32_1 = arith.constant 0 : i32
    return %c0_i32, %c0_i32_0 : i32, i32
  }
  func.func @transform_3(%arg0: i32) -> (i32, i32) {
    %c0_i32 = arith.constant 0 : i32
    %c0_i32_0 = arith.constant 0 : i32
    %c0_i32_1 = arith.constant 0 : i32
    return %c0_i32, %c0_i32_0 : i32, i32
  }
  func.func @transform_4(%arg0: i32) -> (i32, i32) {
    %c0_i32 = arith.constant 0 : i32
    %c0_i32_0 = arith.constant 0 : i32
    %c0_i32_1 = arith.constant 0 : i32
    return %c0_i32, %c0_i32_0 : i32, i32
  }
  func.func @transform_5(%arg0: i32) -> (i32, i32, i32) {
    %c0_i32 = arith.constant 0 : i32
    %c0_i32_0 = arith.constant 0 : i32
    %c0_i32_1 = arith.constant 0 : i32
    return %arg0, %c0_i32, %c0_i32_0 : i32, i32, i32
  }
}

</mosaic_0001>

<bundles_post_ra>
// kernel: tpu_custom_call.1
= control target key start
LH: loop header
LB: loop body
LE: loop exit
PB: predicated region body
PF: predicated region fallthrough
CT: control target
= control target key end

     0   :  { %10 = vsyncpa [#allocation3], 0  ;;  %s948_s0 = inlined_call_operand.vmem [shape: f32[2,4,256], index: 0, kind: input, shape index: {}]   ;;  %s949_s1 = inlined_call_operand.vmem [shape: f32[2,32,1], index: 1, kind: input, shape index: {}]   ;;  %s950_s2 = inlined_call_operand.vmem [shape: f32[32,4], index: 2, kind: input, shape index: {}]   ;;  %s951_s3 = inlined_call_operand.vmem [shape: f32[4,32], index: 3, kind: input, shape index: {}]   ;;  %s952_s4 = inlined_call_operand.vmem [shape: f32[4,1], index: 4, kind: input, shape index: {}]   ;;  %s953_s5 = inlined_call_operand.hbm [shape: f32[2,4,256], index: 5, kind: output, shape index: {}]  }
   0x1   :  { %12 = vsyncpa [#allocation3 + $0x1], 0  ;;  %s823_s18 = smov 0   ;;  %s825_s19 = smov 0  }
   0x2   :  { %s827_s20 = smov 0   ;;  %s829_s21 = smov 0  }
   0x3 LB: > { %s844_s22 = sadd.s32 4294967295, %s788_s21   ;;  %s610_s23 = sadd.s32 4294967294, %s788_s21   ;;  %s788_s21 = sphi %s829_s21, %s959_s21   ;;  %s784_s20 = sphi %s827_s20, %s958_s20   ;;  %s780_s19 = sphi %s825_s19, %s957_s19   ;;  %s776_s18 = sphi %s823_s18, %s956_s18  }
   0x4   : > { %s848_s24 = sadd.s32 1, %s788_s21   ;;  %s140_s25 = sadd.s32 1, %s784_s20 }
   0x5   : > { %s137_s26 = ssub.s32 %s788_s21, %s848_s24  ;;  %p150_p0 = scmp.ne.s32.totalorder %s784_s20, %s780_s19 }
   0x6   : > { %p138_p1 = scmp.eq.s32.totalorder %s137_s26, 0  ;;  %p151_p2 = scmp.eq.s32.totalorder %s844_s22, 1 }
   0x7   : > { %p156_p3 = scmp.ne.s32.totalorder %s780_s19, %s776_s18  ;;  %p157_p4 = scmp.eq.s32.totalorder %s610_s23, 1 }
   0x8   : > { %s859_s27 = scalar_select %p138_p1, %s784_s20, %s140_s25  }
   0x9   : > { %p861_p5 = por %p151_p2, %p150_p0  ;;  %p865_p6 = por %p157_p4, %p156_p3 }
   0xa   : > { %p613_p7 = scmp.ge.s32.totalorder %s788_s21, 1  ;;  %p200_p8 = scmp.lt.s32.totalorder %s788_s21, 3 }
   0xc   : > { %p201_p9 = pnand %p613_p7, %p200_p8 }
   0xd   : > { %p233_p10 = scmp.lt.s32.totalorder (!%p201_p9), %s844_s22, 1  ;;  %v790_v0 = vmov (!%p201_p9), 0.0   ;;  %v791_v1 = vmov (!%p201_p9), 0   ;;  %vm287_vm0 = vcmask (!%p201_p9), 1043456   ;;  %v244_v6 = vld [vmem:[%s950_s2] sm:$0xff] (!%p201_p9)  ;;  %vm274_vm1 = vcmask (!%p201_p9), 31744  }
   0xe   : > { %204 = sbr.rel (%p201_p9) target bundleno = 523 (0x20b), region = 40  ;;  %356 = vmatprep.mubr.f32.mxu0 (!%p201_p9), %v790_v0  ;;  %512 = vmatprep.mubr.f32.mxu1 (!%p201_p9), %v790_v0  ;;  %v245_v9 = vld [vmem:[%s950_s2 + $0x8] sm:$0xff] (!%p201_p9)  ;;  %v438_v10 = vld [vmem:[%s952_s4] sm:$0xf] (!%p201_p9)  ;;  %v246_v11 = vld [vmem:[%s950_s2 + $0x10] sm:$0xff] (!%p201_p9)  ;;  %vm444_vm2 = vcmask (!%p201_p9), 261120  }
   0xf   : > { %691 = vset.pattern.permute.xlu0 (!%p201_p9), %v791_v1  ;;  %692 = vset.pattern.permute.xlu1 (!%p201_p9), %v791_v1  ;;  %v247_v12 = vld [vmem:[%s950_s2 + $0x18] sm:$0xff] (!%p201_p9)  ;;  %s641_s12 = sshll.u32 (!%p201_p9), %s844_s22, 7 }
  0x10   : > { %s906_s17 = scalar_lea.hbm (!%p201_p9), %s953_s5, %s641_s12 }
  0x15   : > { %s234_s30 = scalar_select %p233_p10, %s844_s22, 1 }
  0x16   : > { %s792_s22 = smov [#allocation2]  }
  0x17   : > { %s639_s6 = sshll.u32 %s234_s30, 3  ;;  %s640_s7 = sshll.u32 %s234_s30, 5 }
  0x18   : > { %s237_s10 = scalar_lea.vmem %s948_s0, %s639_s6  ;;  %s242_s13 = scalar_lea.vmem %s949_s1, %s640_s7 }
  0x19   : > { %v243_v2 = vld [vmem:[%s237_s10] sm:$0xff]  ;;  %v250_v5 = vld [vmem:[%s242_s13 + $0x10] sm:$0xff]  ;;  %v249_v7 = vld [vmem:[%s242_s13 + $0x8] sm:$0xff]  ;;  %s230_s10 = sand.u32 1, %s780_s19   ;;  %s730_s26 = sshll.u32 %s792_s22, 4  ;;  %s731_s26 = int_to_ptr.vmem [resolvable:$false] %s730_s26 }
  0x1a   : > { %v248_v3 = vld [vmem:[%s242_s13] sm:$0xff]  ;;  %v273_v4 = vcombine.high %v243_v2, %v243_v2  ;;  %264 = vperm.xlu1 %692, %v250_v5   ;;  %v251_v8 = vld [vmem:[%s242_s13 + $0x18] sm:$0xff]  ;;  %s614_s11 = sshll.u32 %s230_s10, 3  ;;  %s525_s23 = scalar_lea.sflag [#allocation3], %s230_s10 }
  0x1b   : > { %254 = vperm.xlu0 %691, %v248_v3   ;;  %s232_s13 = scalar_lea.vmem [#allocation2], %s614_s11  ;;  %s732_s30 = scalar_lea.vmem %s731_s26, 256 }
  0x1c   : > { %619 = vmatprep.subr.msk.mxu0 %vm287_vm0, %v273_v4  ;;  %s539_s14 = sshll.u32 %s232_s13, 4  ;;  %s908_s14 = int_to_ptr.vmem [resolvable:$true] %s539_s14 }
  0x1d   : > { %620 = vmatpush1.msk.msra.mxu0 %vm287_vm0, %v243_v2  ;;  %s726_s25 = scalar_lea.vmem %s908_s14, 128  ;;  %p733_p0 = scmp.lt.s32.totalorder %s908_s14, %s731_s26 }
  0x1e   : > { %621 = vmatmul.mubr.msk.f32.vlgmr.msra.gmra.mrb[0].mxu0 %vm274_vm1, %v244_v6  ;;  %269 = vperm.xlu1 %692, %v251_v8   ;;  %p727_p11 = scmp.ne.s32.totalorder %s908_s14, %s726_s25  ;;  %p734_p1 = scmp.lt.s32.totalorder %s732_s30, %s726_s25 }
  0x1f   : > { %259 = vperm.xlu0 %691, %v249_v7   ;;  %362 = vmatprep.mubr.f32.mxu0 %v790_v0 }
  0x20   : > { %p728_p12 = pnand %p727_p11, %p861_p5  ;;  %p735_p2 = por %p734_p1, %p733_p0 }
  0x22   : > { %622 = vmatmul.mubr.msk.f32.gmra.mrb[2].mxu0 %vm274_vm1, %v245_v9  ;;  %p729_p13 = pneg %p728_p12 }
  0x23   : > { %441 = vperm.xlu0 %691, %v438_v10   ;;  %368 = vmatprep.mubr.f32.mxu0 %v790_v0 }
  0x24   : > { %p736_p3 = pnand %p735_p2, %p729_p13 }
  0x26   : > { %623 = vmatmul.mubr.msk.f32.gmra.mrb[4].mxu0 %vm274_vm1, %v246_v11 }
  0x27   : > { %374 = vmatprep.mubr.f32.mxu0 %v790_v0 }
  0x2a   : > { %624 = vmatmul.mubr.msk.f32.gmra.mrb[6].mxu0 %vm274_vm1, %v247_v12 }
  0x99   : > { %v265_v24 = vpop.permute.xlu1 %264 }
  0x9a   : > { %v255_v13 = vpop.permute.xlu0 %254 }
  0x9d   : > { %v270_v33 = vpop.permute.xlu1 %269 }
  0x9e   : > { %v260_v19 = vpop.permute.xlu0 %259 }
  0xf1   : > { %v358_v14 = vpop.f32.mrb[0].mxu0 }
  0xf2   : > { %v359_v15 = vadd.f32 %v358_v14, %v255_v13  ;;  %v360_v16 = vpop.f32.mrb[1].mxu0  ;;  %v442_v14 = vpop.permute.xlu0 %441 }
  0xf3   : > { %v361_v17 = vadd.f32 %v360_v16, %v255_v13  ;;  %v437_v13 = vld [vmem:[%s951_s3] sm:$0xf] }
  0xf4   : > { %v625_v18 = vmul.f32 -1.442695, %v359_v15 }
  0xf5   : > { %v626_v20 = vmul.f32 -1.442695, %v361_v17  ;;  %v364_v21 = vpop.f32.mrb[2].mxu0 }
  0xf6   : > { %694 = vpow2.f32 %v625_v18  ;;  %v365_v22 = vadd.f32 %v364_v21, %v260_v19  ;;  %v366_v23 = vpop.f32.mrb[3].mxu0 }
  0xf7   : > { %696 = vpow2.f32 %v626_v20  ;;  %v367_v25 = vadd.f32 %v366_v23, %v260_v19 }
  0xf8   : > { %v627_v26 = vmul.f32 -1.442695, %v365_v22 }
  0xf9   : > { %v628_v27 = vmul.f32 -1.442695, %v367_v25  ;;  %v370_v28 = vpop.f32.mrb[4].mxu0 }
  0xfa   : > { %698 = vpow2.f32 %v627_v26  ;;  %v371_v29 = vadd.f32 %v370_v28, %v265_v24  ;;  %v372_v30 = vpop.f32.mrb[5].mxu0 }
  0xfb   : > { %700 = vpow2.f32 %v628_v27  ;;  %v373_v31 = vadd.f32 %v372_v30, %v265_v24 }
  0xfc   : > { %v629_v32 = vmul.f32 -1.442695, %v371_v29 }
  0xfd   : > { %v630_v34 = vmul.f32 -1.442695, %v373_v31  ;;  %v376_v35 = vpop.f32.mrb[6].mxu0 }
  0xfe   : > { %702 = vpow2.f32 %v629_v32  ;;  %v377_v36 = vadd.f32 %v376_v35, %v270_v33  ;;  %v378_v37 = vpop.f32.mrb[7].mxu0 }
  0xff   : > { %704 = vpow2.f32 %v630_v34  ;;  %v379_v38 = vadd.f32 %v378_v37, %v270_v33 }
 0x100   : > { %v695_v39 = vpop.eup %694  ;;  %v631_v40 = vmul.f32 -1.442695, %v377_v36 }
 0x101   : > { %v697_v41 = vpop.eup %696  ;;  %v405_v42 = vadd.f32 1.0, %v695_v39  ;;  %v632_v43 = vmul.f32 -1.442695, %v379_v38 }
 0x102   : > { %v406_v44 = vadd.f32 1.0, %v697_v41  ;;  %706 = vpow2.f32 %v631_v40 }
 0x103   : > { %708 = vrcp.f32 %v405_v42 }
 0x104   : > { %v699_v45 = vpop.eup %698  ;;  %710 = vpow2.f32 %v632_v43 }
 0x105   : > { %v701_v46 = vpop.eup %700  ;;  %v407_v47 = vadd.f32 1.0, %v699_v45  ;;  %712 = vrcp.f32 %v406_v44 }
 0x106   : > { %v408_v48 = vadd.f32 1.0, %v701_v46 }
 0x107   : > { %714 = vrcp.f32 %v407_v47 }
 0x108   : > { %v703_v49 = vpop.eup %702  ;;  %716 = vrcp.f32 %v408_v48 }
 0x109   : > { %v705_v50 = vpop.eup %704  ;;  %v409_v51 = vadd.f32 1.0, %v703_v49 }
 0x10a   : > { %v410_v53 = vadd.f32 1.0, %v705_v50 }
 0x10b   : > { %718 = vrcp.f32 %v409_v51 }
 0x10c   : > { %v707_v52 = vpop.eup %706 }
 0x10d   : > { %v411_v54 = vadd.f32 1.0, %v707_v52  ;;  %v709_v55 = vpop.eup %708 }
 0x10e   : > { %v711_v56 = vpop.eup %710  ;;  %v429_v61 = vmul.f32 %v709_v55, %v359_v15 }
 0x10f   : > { %720 = vrcp.f32 %v411_v54  ;;  %v713_v57 = vpop.eup %712  ;;  %v412_v58 = vadd.f32 1.0, %v711_v56 }
 0x110   : > { %722 = vrcp.f32 %v410_v53  ;;  %v430_v63 = vmul.f32 %v713_v57, %v361_v17 }
 0x111   : > { %v715_v59 = vpop.eup %714  ;;  %724 = vrcp.f32 %v412_v58 }
 0x112   : > { %v717_v60 = vpop.eup %716  ;;  %v431_v62 = vmul.f32 %v715_v59, %v365_v22 }
 0x113   : > { %v432_v0 = vmul.f32 %v717_v60, %v367_v25 }
 0x114   : > { %v644_v1 = vpack.c.bf16 %v431_v62, %v429_v61 }
 0x115   : > { %v642_v2 = vpack.c.bf16 %v432_v0, %v430_v63  ;;  %v719_v3 = vpop.eup %718 }
 0x116   : > { %v433_v6 = vmul.f32 %v719_v3, %v371_v29 }
 0x117   : > { %643 = vmatprep.subr.bf16.mxu1 %v642_v2 }
 0x118   : > { %645 = vmatpush1.bf16.msra.mxu1 %v644_v1 }
 0x119   : > { %v721_v4 = vpop.eup %720 }
 0x11a   : > { %v723_v5 = vpop.eup %722  ;;  %v435_v7 = vmul.f32 %v721_v4, %v377_v36 }
 0x11b   : > { %v725_v8 = vpop.eup %724  ;;  %v434_v10 = vmul.f32 %v723_v5, %v373_v31 }
 0x11c   : > { %v648_v9 = vpack.c.bf16 %v435_v7, %v433_v6  ;;  %v436_v11 = vmul.f32 %v725_v8, %v379_v38 }
 0x11e   : > { %v646_v12 = vpack.c.bf16 %v436_v11, %v434_v10 }
 0x120   : > { %647 = vmatprep.subr.bf16.mxu1 %v646_v12 }
 0x121   : > { %649 = vmatpush1.bf16.msra.mxu1 %v648_v9 }
 0x124   : > { %633 = vmatmul.mubr.msk.f32.vlgmr.msra.gmra.mrb[0].mxu1 %vm444_vm2, %v437_v13 }
 0x1f7   : > { %v514_v15 = vpop.f32.mrb[0].mxu1 }
 0x1f8   : > { %v515_v16 = vadd.f32 %v514_v15, %v442_v14  ;;  %v516_v17 = vpop.f32.mrb[1].mxu1 }
 0x1f9   : > { %v517_v18 = vadd.f32 %v516_v17, %v442_v14 }
 0x1fb   : > { %v521_v19 = vcombine.low %v515_v16, %v517_v18 }
 0x1fd   : > { %523 = vst [vmem:[%s232_s13] sm:$0xff] %v521_v19 }
 0x1fe   : > { %739 = shalt.err (!%p736_p3)
}
 0x1ff   : > { %s740_s6 = scalar_lea.hbm %s906_s17, 128  ;;  %s744_s9 = scalar_lea.hbm %s953_s5, 256 }
 0x200   : > { %p741_p4 = scmp.ne.s32.totalorder %s906_s17, %s740_s6  ;;  %p745_p9 = scmp.lt.u32.totalorder %s906_s17, %s953_s5 }
 0x201   : > { %p746_p10 = scmp.lt.u32.totalorder %s744_s9, %s740_s6  ;;  %p748_p12 = scmp.lt.u32.totalorder %s740_s6, %s906_s17 }
 0x202   : > { %p742_p7 = pnand %p741_p4, %p861_p5 }
 0x203   : > { %p747_p11 = por %p746_p10, %p745_p9 }
 0x204   : > { %p743_p8 = pneg %p742_p7 }
 0x205   : > { %p749_p13 = por %p748_p12, %p747_p11 }
 0x207   : > { %p750_p0 = pnand %p749_p13, %p743_p8 }
 0x209   : > { %753 = shalt.err (!%p750_p0)
}
 0x20a   : > { %650 = dma.vmem_to_hbm [thread:$0]  (%p861_p5), %s908_s14, 128, %s906_s17, %s525_s23  }
 0x20b PF: > { %p656_p1 = scmp.ge.s32.totalorder %s788_s21, 2  ;;  %s551_s12 = sand.u32 1, %s776_s18  }
 0x20c   : > { %s552_s13 = scalar_lea.sflag [#allocation3], %s551_s12 }
 0x20d   : > { %p653_p2 = pnand %p656_p1, %p865_p6 }
 0x20f   : > { %771 = dma.done.wait (!%p653_p2), %s552_s13, 128  }
 0x210   : > { %773 = vsyncadd (!%p653_p2), %s552_s13, 4294967168  ;;  %p15_p3 = scmp.ge.s32.totalorder %s848_s24, 4   ;;  %s956_s18 = smov %s780_s19 }
 0x211   : > { %s957_s19 = smov %s784_s20  ;;  %s958_s20 = smov %s859_s27 }
 0x212   : > { %s959_s21 = smov %s848_s24  ;;  %17 = sbr.rel (!%p15_p3) target bundleno = 3 (0x3), region = 78 }
 0x219   :  { %557 = vsyncpa [#allocation3], 1 }
 0x21a   :  { %559 = vsyncpa [#allocation3 + $0x1], 1 }

</bundles_post_ra>
